<compile_context>
chip_gen: v6e
topology: v6e:2x2x1
jax: 0.10.0
libtpu: 0.0.40
codegen_flags: <defaults>
</compile_context>

<pallas_src>
import functools
import math

import jax
import jax.numpy as jnp
from jax import lax
from jax.experimental import pallas as pl
from jax.experimental.pallas import tpu as pltpu

_MASK_VALUE = -10000000000.0  # matches the PyTorch masked_fill value


# --------------------------------------------------------------------------
# Kernel 1: fused QKV projection (q pre-scaled by 1/sqrt(D), bf16 staging)
# --------------------------------------------------------------------------
def _qkv_proj_kernel(x_ref, wqkv_ref, bqkv_ref, q_ref, k_ref, v_ref, *, scale):
    C = q_ref.shape[-1]
    x = x_ref[...].astype(jnp.bfloat16)
    # one (tq, C) x (C, 3C) MXU matmul, f32 accumulation, f32 bias add
    qkv = jnp.dot(x, wqkv_ref[...], preferred_element_type=jnp.float32) + bqkv_ref[...]
    q_ref[...] = (qkv[:, 0:C] * scale).astype(q_ref.dtype)      # scale folded into q
    k_ref[...] = qkv[:, C:2 * C].astype(k_ref.dtype)
    v_ref[...] = qkv[:, 2 * C:3 * C].astype(v_ref.dtype)


# --------------------------------------------------------------------------
# Kernel 2: flash-style causal attention + output projection
# --------------------------------------------------------------------------
def _flash_attn_kernel(q_ref, k_ref, v_ref, wp_ref, bp_ref, o_ref,
                       acc_ref, m_ref, l_ref, *, n_head):
    tq, C = q_ref.shape
    tk = k_ref.shape[0]
    D = C // n_head

    qi = pl.program_id(1)
    ki = pl.program_id(2)
    nk = pl.num_programs(2)

    q_start = qi * tq
    k_start = ki * tk

    @pl.when(ki == 0)
    def _init():
        acc_ref[...] = jnp.zeros_like(acc_ref)
        m_ref[...] = jnp.full_like(m_ref, -jnp.inf)
        l_ref[...] = jnp.zeros_like(l_ref)

    # Skip KV tiles that lie entirely above the causal diagonal.
    @pl.when(k_start < q_start + tq)
    def _compute():
        # per-tile causal mask, built once and shared by every head
        row = q_start + lax.broadcasted_iota(jnp.int32, (tq, tk), 0)
        col = k_start + lax.broadcasted_iota(jnp.int32, (tq, tk), 1)
        causal = col <= row

        for h in range(n_head):             # static lane slices; scratch-bounded live ranges
            lo = h * D
            q_h = q_ref[:, lo:lo + D]       # (tq, D) bf16, already scaled
            k_h = k_ref[:, lo:lo + D]       # (tk, D) bf16
            v_h = v_ref[:, lo:lo + D]       # (tk, D) bf16

            # scores: contract the head dim directly (no transpose), f32 accumulation
            s = lax.dot_general(q_h, k_h, (((1,), (1,)), ((), ())),
                                preferred_element_type=jnp.float32)   # (tq, tk)
            s = jnp.where(causal, s, _MASK_VALUE)

            # online softmax update (f32)
            m_prev = m_ref[h, :, :]                                   # (tq, 1)
            m_new = jnp.maximum(m_prev, jnp.max(s, axis=-1, keepdims=True))
            alpha = jnp.exp(m_prev - m_new)
            p = jnp.exp(s - m_new)

            l_ref[h, :, :] = alpha * l_ref[h, :, :] + jnp.sum(p, axis=-1, keepdims=True)
            m_ref[h, :, :] = m_new

            # weighted values: (tq, tk) x (tk, D), bf16 in / f32 accumulate
            y_h = jnp.dot(p.astype(jnp.bfloat16), v_h,
                          preferred_element_type=jnp.float32)
            acc_ref[:, lo:lo + D] = alpha * acc_ref[:, lo:lo + D] + y_h

        # attn_drop: identity (eval mode)

    @pl.when(ki == nk - 1)
    def _finalize():
        # normalize each head by its softmax denominator (EUP reciprocal ~ free)
        for h in range(n_head):
            lo = h * D
            inv = pl.reciprocal(l_ref[h, :, :], approx=True)
            acc_ref[:, lo:lo + D] = acc_ref[:, lo:lo + D] * inv
        # fused output projection for this query tile
        y = acc_ref[...].astype(jnp.bfloat16)
        out = jnp.dot(y, wp_ref[...], preferred_element_type=jnp.float32) + bp_ref[...]
        # resid_drop: identity (eval mode)
        o_ref[...] = out.astype(o_ref.dtype)


# --------------------------------------------------------------------------
# Wrapper
# --------------------------------------------------------------------------
def _seq_tile(T, target):
    """Largest convenient tile that divides T (multiple of 8, or T itself)."""
    if T % target == 0:
        return target
    for t in (512, 256, 128, 64, 32, 16, 8):
        if t <= target and T % t == 0:
            return t
    return T


def _vmem_limit(estimate_bytes):
    # generous headroom for compiler temporaries, capped below v7x's 64 MiB VMEM
    return int(min(max(2 * estimate_bytes + (4 << 20), 16 << 20), 48 << 20))


def _const_spec(shape):
    # Constant operand (grid-independent index map): single-buffer it so the
    # default double buffer does not waste VMEM (matters most on v7x's 64 MiB).
    return pl.BlockSpec(shape, lambda *_: (0,) * len(shape),
                        pipeline_mode=pl.Buffered(1))


def causal_self_attention(x, params, n_head, *, tq=256, tk=256):
    """x: (B, T, C). params: dict with wk,bk,wq,bq,wv,bv,wp,bp in PyTorch layout."""
    B, T, C = x.shape
    assert C % n_head == 0
    D = C // n_head
    scale = 1.0 / math.sqrt(D)

    # 256-wide tiles feed the v6e/v7x 256-deep MXU; also <= 256 for v7x VMEM budget.
    tq = _seq_tile(T, tq)
    tk = _seq_tile(T, tk)

    # PyTorch nn.Linear weights are (out, in); pre-transpose ONCE to (in, out),
    # fuse q/k/v into a single (C, 3C) weight, store weights in bf16 (f32 accumulate).
    wqkv_t = jnp.concatenate(
        [params["wq"].T, params["wk"].T, params["wv"].T], axis=1).astype(jnp.bfloat16)
    bqkv = jnp.concatenate(
        [params["bq"], params["bk"], params["bv"]]).reshape(1, 3 * C).astype(jnp.float32)
    wp_t = params["wp"].T.astype(jnp.bfloat16)
    bp = params["bp"].reshape(1, C).astype(jnp.float32)

    # ---- kernel 1: fused QKV projection ----
    est_a = (2 * tq * C * 4            # x blocks (double-buffered, f32)
             + C * 3 * C * 2           # fused QKV weight (single-buffered, bf16)
             + 3 * C * 4               # bias
             + 3 * 2 * tq * C * 2      # q/k/v output blocks (double-buffered, bf16)
             + 2 * tq * 3 * C * 4)     # in-kernel f32 qkv value
    qkv_fn = pl.pallas_call(
        functools.partial(_qkv_proj_kernel, scale=scale),
        out_shape=(jax.ShapeDtypeStruct((B, T, C), jnp.bfloat16),) * 3,
        grid_spec=pltpu.PrefetchScalarGridSpec(
            num_scalar_prefetch=0,
            grid=(B, T // tq),
            in_specs=[
                pl.BlockSpec((None, tq, C), lambda b, i: (b, i, 0)),   # x
                _const_spec((C, 3 * C)),                               # fused QKV weight
                _const_spec((1, 3 * C)),                               # fused QKV bias
            ],
            out_specs=[pl.BlockSpec((None, tq, C), lambda b, i: (b, i, 0))] * 3,
        ),
        compiler_params=pltpu.CompilerParams(
            dimension_semantics=("parallel", "parallel"),
            vmem_limit_bytes=_vmem_limit(est_a)),
    )
    q, k, v = qkv_fn(x, wqkv_t, bqkv)

    # ---- kernel 2: flash attention + output projection ----
    est_b = (2 * tq * C * 2 + 4 * tk * C * 2     # q + k/v blocks (double-buffered, bf16)
             + C * C * 2 + C * 4                 # proj weight/bias (single-buffered)
             + 2 * tq * C * x.dtype.itemsize     # output blocks
             + tq * C * 4                        # acc scratch
             + 2 * n_head * tq * 128 * 4         # m/l scratch (lane-padded)
             + 4 * tq * tk * 4)                  # per-head score/exp temporaries
    attn_fn = pl.pallas_call(
        functools.partial(_flash_attn_kernel, n_head=n_head),
        out_shape=jax.ShapeDtypeStruct((B, T, C), x.dtype),
        grid_spec=pltpu.PrefetchScalarGridSpec(
            num_scalar_prefetch=0,
            grid=(B, T // tq, T // tk),
            in_specs=[
                pl.BlockSpec((None, tq, C), lambda b, i, j: (b, i, 0)),  # q tile
                pl.BlockSpec((None, tk, C), lambda b, i, j: (b, j, 0)),  # k tile
                pl.BlockSpec((None, tk, C), lambda b, i, j: (b, j, 0)),  # v tile
                _const_spec((C, C)),                                     # proj weight
                _const_spec((1, C)),                                     # proj bias
            ],
            out_specs=pl.BlockSpec((None, tq, C), lambda b, i, j: (b, i, 0)),
            scratch_shapes=[
                pltpu.VMEM((tq, C), jnp.float32),            # per-head output accumulator
                pltpu.VMEM((n_head, tq, 1), jnp.float32),    # running max m
                pltpu.VMEM((n_head, tq, 1), jnp.float32),    # running denom l
            ],
        ),
        compiler_params=pltpu.CompilerParams(
            dimension_semantics=("parallel", "parallel", "arbitrary"),
            vmem_limit_bytes=_vmem_limit(est_b)),
    )
    return attn_fn(q, k, v, wp_t, bp)


# --------------------------------------------------------------------------
# Pure-JAX reference + self-test
# --------------------------------------------------------------------------
def _reference(x, params, n_head):
    """Pure-JAX f32 reference matching the PyTorch forward (dropout = identity)."""
    B, T, C = x.shape
    D = C // n_head
    lin = lambda a, w, b: jnp.einsum('btc,oc->bto', a, w) + b
    k = lin(x, params["wk"], params["bk"]).reshape(B, T, n_head, D).transpose(0, 2, 1, 3)
    q = lin(x, params["wq"], params["bq"]).reshape(B, T, n_head, D).transpose(0, 2, 1, 3)
    v = lin(x, params["wv"], params["bv"]).reshape(B, T, n_head, D).transpose(0, 2, 1, 3)
    att = jnp.einsum('bhtd,bhsd->bhts', q, k) * (1.0 / math.sqrt(D))
    mask = jnp.tril(jnp.ones((T, T), jnp.float32))[None, None]
    att = jnp.where(mask == 0, _MASK_VALUE, att)
    att = jax.nn.softmax(att, axis=-1)
    y = jnp.einsum('bhts,bhsd->bhtd', att, v).transpose(0, 2, 1, 3).reshape(B, T, C)
    return lin(y, params["wp"], params["bp"])


if __name__ == "__main__":
    B, T, C, n_head = 2, 8, 32, 4

    key = jax.random.PRNGKey(0)
    keys = jax.random.split(key, 9)
    bound = 1.0 / math.sqrt(C)  # PyTorch nn.Linear default init range
    params = {
        "wk": jax.random.uniform(keys[0], (C, C), jnp.float32, -bound, bound),
        "bk": jax.random.uniform(keys[1], (C,), jnp.float32, -bound, bound),
        "wq": jax.random.uniform(keys[2], (C, C), jnp.float32, -bound, bound),
        "bq": jax.random.uniform(keys[3], (C,), jnp.float32, -bound, bound),
        "wv": jax.random.uniform(keys[4], (C, C), jnp.float32, -bound, bound),
        "bv": jax.random.uniform(keys[5], (C,), jnp.float32, -bound, bound),
        "wp": jax.random.uniform(keys[6], (C, C), jnp.float32, -bound, bound),
        "bp": jax.random.uniform(keys[7], (C,), jnp.float32, -bound, bound),
    }
    x = jax.random.normal(keys[8], (B, T, C), jnp.float32)

    out = causal_self_attention(x, params, n_head)
    out = jax.block_until_ready(out)

    ref = _reference(x, params, n_head)
    assert out.shape == (B, T, C)
    # bf16 MXU inputs (f32 accumulation) -> tolerance is looser than pure-f32.
    assert jnp.allclose(out, ref, atol=3e-2, rtol=3e-2), "mismatch vs reference"

    print("KERNEL_OK")
</pallas_src>

<mosaic_0001>
module attributes {stable_mosaic.version = 11 : i64} {
  func.func @_qkv_proj_kernel(%arg0: i32, %arg1: i32, %arg2: memref<1x8x32xf32, #tpu.memory_space<vmem>>, %arg3: memref<32x96xbf16, #tpu.memory_space<vmem>>, %arg4: memref<1x96xf32, #tpu.memory_space<vmem>>, %arg5: memref<1x8x32xbf16, #tpu.memory_space<vmem>>, %arg6: memref<1x8x32xbf16, #tpu.memory_space<vmem>>, %arg7: memref<1x8x32xbf16, #tpu.memory_space<vmem>>) attributes {dimension_semantics = [#tpu.dimension_semantics<parallel>, #tpu.dimension_semantics<parallel>], iteration_bounds = array<i64: 2, 1>, scalar_prefetch = 0 : i64, scratch_operands = 0 : i64, tpu.core_type = #tpu.core_type<tc>, window_params = [{transform_indices = @transform_0, window_bounds = array<i64: 1, 8, 32>}, {pipeline_mode = #tpu.pipeline_mode<synchronous>, transform_indices = @transform_1, window_bounds = array<i64: 32, 96>}, {pipeline_mode = #tpu.pipeline_mode<synchronous>, transform_indices = @transform_2, window_bounds = array<i64: 1, 96>}, {transform_indices = @transform_3, window_bounds = array<i64: 1, 8, 32>}, {transform_indices = @transform_4, window_bounds = array<i64: 1, 8, 32>}, {transform_indices = @transform_5, window_bounds = array<i64: 1, 8, 32>}]} {
    %c0 = arith.constant 0 : index
    %c0_0 = arith.constant 0 : index
    %c0_1 = arith.constant 0 : index
    %0 = vector.load %arg2[%c0, %c0_0, %c0_1] : memref<1x8x32xf32, #tpu.memory_space<vmem>>, vector<1x8x32xf32>
    %1 = vector.shape_cast %0 : vector<1x8x32xf32> to vector<8x32xf32>
    %2 = arith.truncf %1 : vector<8x32xf32> to vector<8x32xbf16>
    %c0_2 = arith.constant 0 : index
    %c0_3 = arith.constant 0 : index
    %3 = vector.load %arg3[%c0_2, %c0_3] : memref<32x96xbf16, #tpu.memory_space<vmem>>, vector<32x96xbf16>
    %cst = arith.constant dense<0.000000e+00> : vector<8x96xf32>
    %4 = tpu.matmul %2, %3, %cst {dimension_numbers = #tpu.dot_dimension_numbers<[1], [0], [0], [1], [0, 0, 1, 1], [], []>} : vector<8x32xbf16>, vector<32x96xbf16>, vector<8x96xf32> -> vector<8x96xf32>
    %c0_4 = arith.constant 0 : index
    %c0_5 = arith.constant 0 : index
    %5 = vector.load %arg4[%c0_4, %c0_5] : memref<1x96xf32, #tpu.memory_space<vmem>>, vector<1x96xf32>
    %6 = vector.broadcast %5 : vector<1x96xf32> to vector<8x96xf32>
    %7 = arith.addf %4, %6 : vector<8x96xf32>
    %8 = vector.extract_strided_slice %7 {offsets = [0, 0], sizes = [8, 32], strides = [1, 1]} : vector<8x96xf32> to vector<8x32xf32>
    %cst_6 = arith.constant 0.353553385 : f32
    %9 = vector.broadcast %cst_6 : f32 to vector<8x32xf32>
    %10 = arith.mulf %8, %9 : vector<8x32xf32>
    %11 = arith.truncf %10 : vector<8x32xf32> to vector<8x32xbf16>
    %c0_7 = arith.constant 0 : index
    %c0_8 = arith.constant 0 : index
    %c0_9 = arith.constant 0 : index
    %12 = vector.load %arg5[%c0_7, %c0_8, %c0_9] : memref<1x8x32xbf16, #tpu.memory_space<vmem>>, vector<1x8x32xbf16>
    %13 = vector.shape_cast %12 : vector<1x8x32xbf16> to vector<8x32xbf16>
    %14 = vector.shape_cast %11 : vector<8x32xbf16> to vector<1x8x32xbf16>
    tpu.vector_store %arg5[%c0_7, %c0_8, %c0_9], %14 {strides = array<i32>} : memref<1x8x32xbf16, #tpu.memory_space<vmem>>, vector<1x8x32xbf16>,
    %15 = vector.extract_strided_slice %7 {offsets = [0, 32], sizes = [8, 32], strides = [1, 1]} : vector<8x96xf32> to vector<8x32xf32>
    %16 = arith.truncf %15 : vector<8x32xf32> to vector<8x32xbf16>
    %c0_10 = arith.constant 0 : index
    %c0_11 = arith.constant 0 : index
    %c0_12 = arith.constant 0 : index
    %17 = vector.load %arg6[%c0_10, %c0_11, %c0_12] : memref<1x8x32xbf16, #tpu.memory_space<vmem>>, vector<1x8x32xbf16>
    %18 = vector.shape_cast %17 : vector<1x8x32xbf16> to vector<8x32xbf16>
    %19 = vector.shape_cast %16 : vector<8x32xbf16> to vector<1x8x32xbf16>
    tpu.vector_store %arg6[%c0_10, %c0_11, %c0_12], %19 {strides = array<i32>} : memref<1x8x32xbf16, #tpu.memory_space<vmem>>, vector<1x8x32xbf16>,
    %20 = vector.extract_strided_slice %7 {offsets = [0, 64], sizes = [8, 32], strides = [1, 1]} : vector<8x96xf32> to vector<8x32xf32>
    %21 = arith.truncf %20 : vector<8x32xf32> to vector<8x32xbf16>
    %c0_13 = arith.constant 0 : index
    %c0_14 = arith.constant 0 : index
    %c0_15 = arith.constant 0 : index
    %22 = vector.load %arg7[%c0_13, %c0_14, %c0_15] : memref<1x8x32xbf16, #tpu.memory_space<vmem>>, vector<1x8x32xbf16>
    %23 = vector.shape_cast %22 : vector<1x8x32xbf16> to vector<8x32xbf16>
    %24 = vector.shape_cast %21 : vector<8x32xbf16> to vector<1x8x32xbf16>
    tpu.vector_store %arg7[%c0_13, %c0_14, %c0_15], %24 {strides = array<i32>} : memref<1x8x32xbf16, #tpu.memory_space<vmem>>, vector<1x8x32xbf16>,
    return
  }
  func.func @transform_0(%arg0: i32, %arg1: i32) -> (i32, i32, i32) {
    %c0_i32 = arith.constant 0 : i32
    %c0_i32_0 = arith.constant 0 : i32
    return %arg0, %arg1, %c0_i32 : i32, i32, i32
  }
  func.func @transform_1(%arg0: i32, %arg1: i32) -> (i32, i32) {
    %c0_i32 = arith.constant 0 : i32
    %c0_i32_0 = arith.constant 0 : i32
    %c0_i32_1 = arith.constant 0 : i32
    return %c0_i32, %c0_i32_0 : i32, i32
  }
  func.func @transform_2(%arg0: i32, %arg1: i32) -> (i32, i32) {
    %c0_i32 = arith.constant 0 : i32
    %c0_i32_0 = arith.constant 0 : i32
    %c0_i32_1 = arith.constant 0 : i32
    return %c0_i32, %c0_i32_0 : i32, i32
  }
  func.func @transform_3(%arg0: i32, %arg1: i32) -> (i32, i32, i32) {
    %c0_i32 = arith.constant 0 : i32
    %c0_i32_0 = arith.constant 0 : i32
    return %arg0, %arg1, %c0_i32 : i32, i32, i32
  }
  func.func @transform_4(%arg0: i32, %arg1: i32) -> (i32, i32, i32) {
    %c0_i32 = arith.constant 0 : i32
    %c0_i32_0 = arith.constant 0 : i32
    return %arg0, %arg1, %c0_i32 : i32, i32, i32
  }
  func.func @transform_5(%arg0: i32, %arg1: i32) -> (i32, i32, i32) {
    %c0_i32 = arith.constant 0 : i32
    %c0_i32_0 = arith.constant 0 : i32
    return %arg0, %arg1, %c0_i32 : i32, i32, i32
  }
}

</mosaic_0001>

<bundles_post_ra>
// kernel: tpu_custom_call.1
= control target key start
LH: loop header
LB: loop body
LE: loop exit
PB: predicated region body
PF: predicated region fallthrough
CT: control target
= control target key end

     0   :  { %s1193_s0 = inlined_call_operand.hbm [shape: f32[2,8,32], index: 0, kind: input, shape index: {}]   ;;  %s1194_s1 = inlined_call_operand.hbm [shape: bf16[32,96], index: 1, kind: input, shape index: {}]   ;;  %s1195_s2 = inlined_call_operand.vmem [shape: f32[1,96], index: 2, kind: input, shape index: {}]   ;;  %s1196_s3 = inlined_call_operand.hbm [shape: bf16[2,8,32], index: 3, kind: output, shape index: {0}]   ;;  %s1197_s4 = inlined_call_operand.hbm [shape: bf16[2,8,32], index: 4, kind: output, shape index: {1}]   ;;  %s1198_s5 = inlined_call_operand.hbm [shape: bf16[2,8,32], index: 5, kind: output, shape index: {2}]  }
   0x1   :  { %1202 = sst [smem:[#allocation16_spill]] %s1194_s1 }
   0x2   :  { %11 = vsyncpa [#allocation3], 0 }
   0x3   :  { %13 = vsyncpa [#allocation3 + $0x1], 0 }
   0x4   :  { %14 = vsyncpa [#allocation6], 0 }
   0x5   :  { %15 = vsyncpa [#allocation4], 0 }
   0x6   :  { %17 = vsyncpa [#allocation4 + $0x1], 0 }
   0x7   :  { %18 = vsyncpa [#allocation9], 0 }
   0x8   :  { %20 = vsyncpa [#allocation9 + $0x1], 0  ;;  %s952_s18 = smov 0   ;;  %s954_s19 = smov 0  }
   0x9   :  { %s956_s20 = smov 0   ;;  %s958_s21 = smov 0  }
   0xa   :  { %s960_s22 = smov 0   ;;  %s962_s23 = smov 0  }
   0xb LB: > { %s983_s24 = sadd.s32 4294967295, %s909_s23   ;;  %s1199_s25 = sadd.s32 4294967294, %s909_s23   ;;  %s909_s23 = sphi %s962_s23, %s26_s23   ;;  %s905_s22 = sphi %s960_s22, %s1223_s22   ;;  %s901_s21 = sphi %s958_s21, %s1222_s21   ;;  %s897_s20 = sphi %s956_s20, %s1221_s20   ;;  %s893_s19 = sphi %s954_s19, %s1220_s19   ;;  %s889_s18 = sphi %s952_s18, %s1219_s18  }
   0xc   : > { %p60_p0 = scmp.ne.s32.totalorder %s893_s19, %s889_s18  ;;  %p1201_p1 = scmp.eq.s32.totalorder %s983_s24, 0 }
   0xd   : > { %p134_p3 = scmp.eq.s32.totalorder %s1199_s25, 1  ;;  %p588_p5 = scmp.ge.s32.totalorder %s909_s23, 1 }
   0xe   : > { %p994_p4 = por %p1201_p1, %p60_p0  ;;  %p197_p7 = scmp.lt.s32.totalorder %s909_s23, 3 }
   0xf   : > { %p999_p6 = por %p134_p3, %p60_p0  ;;  %s911_s29 = smov [#allocation5]  }
  0x10   : > { %p1004_p8 = pnand %p588_p5, %p197_p7  ;;  %s209_s30 = sshll.u32 %s911_s29, 4  ;;  %s210_s30 = int_to_ptr.vmem [resolvable:$true] %s209_s30 }
  0x11   : > { %s1204_s27 = scalar_select %p999_p6, 1, 0 }
  0x12   : > { %p636_p9 = pneg %p1004_p8  ;;  %s38_s7 = sadd.s32 1, %s905_s22 }
  0x13   : > { %s726_s8 = scalar_lea.vmem %s210_s30, 256  ;;  %p734_p5 = scmp.lt.s32.totalorder %s210_s30, %s210_s30 }
  0x14   : > { %p1013_p11 = pnand %p636_p9, %p1201_p1  ;;  %p727_p13 = scmp.ne.s32.totalorder %s210_s30, %s726_s8 }
  0x15   : > { %p735_p7 = scmp.lt.s32.totalorder %s726_s8, %s726_s8 }
  0x16   : > { %p717_p12 = pneg %p1013_p11 }
  0x17   : > { %p736_p2 = por %p735_p7, %p734_p5 }
  0x18   : > { %p729_p0 = pnand %p727_p13, %p717_p12 }
  0x1a   : > { %p730_p3 = pneg %p729_p0 }
  0x1c   : > { %p737_p6 = pnand %p736_p2, %p730_p3 }
  0x1e   : > { %740 = shalt.err (!%p737_p6)
}
  0x1f   : > { %s912_s9 = smov 64   ;;  %s913_s10 = smov 4  }
  0x20   : > { %s1207_s1 = sld [smem:[#allocation16_spill]]  ;;  %p40_p2 = scmp.ge.s32.totalorder %s38_s7, 2 }
  0x21   : > { %s47_s13 = sadd.s32 1, %s897_s20  ;;  %p54_p6 = scmp.ne.s32.totalorder %s897_s20, %s893_s19 }
  0x22   : > { %p55_p9 = scmp.eq.s32.totalorder %s909_s23, 0  ;;  %s1225_s7 = smov (%p40_p2, %s38_s7), 0 }
  0x23   : > { %1208 = sst [smem:[#allocation15_spill]] %s1225_s7  ;;  %p1210_p13 = scmp.eq.s32.totalorder %s983_s24, 1 }
  0x24   : > { %p1031_p12 = por %p55_p9, %p54_p6  ;;  %s42_s16 = ssub.s32 %s905_s22, %s1225_s7 }
  0x25   : > { %p1037_p0 = por %p1210_p13, %p54_p6  ;;  %p655_p3 = scmp.lt.s32.totalorder %s909_s23, 2 }
  0x26   : > { %639 = dma.hbm_to_vmem [thread:$0]  (!%p1013_p11), %s1207_s1, 256, %s210_s30, [#allocation6], %s912_s9, %s912_s9, %s913_s10  }
  0x27   : > { %p45_p11 = scmp.eq.s32.totalorder %s42_s16, 0  ;;  %s226_s17 = sand.u32 1, %s897_s20  }
  0x28   : > { %s591_s29 = sshll.u32 %s226_s17, 3  ;;  %s592_s6 = sshll.u32 %s905_s22, 7 }
  0x29   : > { %s1046_s30 = scalar_select %p45_p11, %s897_s20, %s47_s13  }
  0x2a   : > { %s236_s10 = scalar_lea.hbm %s1193_s0, %s592_s6  ;;  %s230_s11 = scalar_lea.vmem [#allocation2], %s591_s29 }
  0x2b   : > { %s238_s12 = sshll.u32 %s230_s11, 4  ;;  %p1054_p5 = pnand %p655_p3, %p1031_p12  ;;  %s239_s12 = int_to_ptr.vmem [resolvable:$true] %s238_s12 }
  0x2c   : > { %s227_s1 = scalar_lea.sflag [#allocation3], %s226_s17  ;;  %s754_s16 = scalar_lea.vmem %s239_s12, 128 }
  0x2d   : > { %p743_p7 = pneg %p1054_p5  ;;  %p755_p2 = scmp.ne.s32.totalorder %s239_s12, %s754_s16 }
  0x2e   : > { %s914_s13 = smov [#allocation2]  }
  0x2f   : > { %p757_p6 = pnand %p755_p2, %p743_p7  ;;  %s759_s7 = sshll.u32 %s914_s13, 4  ;;  %s760_s7 = int_to_ptr.vmem [resolvable:$false] %s759_s7 }
  0x30   : > { %s761_s6 = scalar_lea.vmem %s760_s7, 256  ;;  %p762_p13 = scmp.lt.s32.totalorder %s239_s12, %s760_s7 }
  0x31   : > { %p758_p9 = pneg %p757_p6  ;;  %p763_p11 = scmp.lt.s32.totalorder %s761_s6, %s754_s16 }
  0x33   : > { %p764_p10 = por %p763_p11, %p762_p13 }
  0x35   : > { %p765_p1 = pnand %p764_p10, %p758_p9 }
  0x37   : > { %768 = shalt.err (!%p765_p1)
}
  0x38   : > { %643 = dma.hbm_to_vmem [thread:$0]  (!%p1054_p5), %s236_s10, 128, %s239_s12, %s227_s1  }
  0x39   : > { %247 = sbr.rel (%p1004_p8) target bundleno = 422 (0x1a6), region = 32  ;;  %s1065_s14 = sand.u32 (!%p1004_p8), 1, %s893_s19  }
  0x3a   : > { %s594_s17 = sshll.u32 (!%p1004_p8), %s1065_s14, 3  ;;  %s250_s29 = scalar_lea.sflag (!%p1004_p8), [#allocation3], %s1065_s14 }
  0x3b   : > { %s253_s8 = scalar_lea.vmem (!%p1004_p8), [#allocation2], %s594_s17 }
  0x3e   : > { %872 = dma.done.wait (%p994_p4), %s250_s29, 128  }
  0x3f   : > { %874 = vsyncadd (%p994_p4), %s250_s29, 4294967168  ;;  %p1213_p1 = scmp.eq.s32.totalorder %s983_s24, 0 }
  0x41   : > { %876 = dma.done.wait (%p1213_p1), [#allocation6], 256   ;;  %p1214_p10 = pmov %p1213_p1 }
  0x42   : > { %v915_v0 = vmov 0.0   ;;  %vm916_vm0 = vmmov 0   ;;  %v713_v1 = vld [vmem:[#allocation5 + $0x8] sm:$0xff]   ;;  %v714_v2 = vld [vmem:[#allocation5] sm:$0xff]   ;;  %v295_v3 = vld [vmem:[%s253_s8] sm:$0xff]  ;;  %vm320_vm1 = vcmask 261120  }
  0x43   : > { %878 = vsyncadd (%p1214_p10), [#allocation6], 4294967040  ;;  %616 = vmatprep.subr.bf16.mxu0 %v915_v0  ;;  %620 = vmatprep.mubr.msk.bf16.mxu0 %vm916_vm0, %v915_v0  ;;  %v296_v4 = vpack.c.bf16 %v295_v3, %v295_v3  ;;  %v599_v5 = vld [vmem:[%s1195_s2] ss:$0 sm:$0xff]  ;;  %s1081_s26 = sshll.u32 %s1065_s14, 2  ;;  %s1084_s28 = sshll.u32 %s901_s21, 6 }
  0x44   : > { %617 = vmatpush3.bf16.msra.mxu0 %v713_v1  ;;  %s279_s7 = scalar_lea.vmem [#allocation7], %s1081_s26  ;;  %vm366_vm2 = vcmask 257024   ;;  %s917_s10 = smov 96  }
  0x45   : > { %618 = vmatprep.subr.bf16.mxu0 %v915_v0  ;;  %s405_s9 = sshll.u32 %s279_s7, 4  ;;  %s1091_s16 = scalar_lea.hbm %s1196_s3, %s1084_s28  ;;  %s406_s9 = int_to_ptr.vmem [resolvable:$true] %s405_s9 }
  0x46   : > { %s381_s21 = scalar_lea.sflag [#allocation4], %s1065_s14  ;;  %s769_s13 = scalar_lea.vmem %s406_s9, 64 }
  0x47   : > { %p770_p4 = scmp.ne.s32.totalorder %s406_s9, %s769_s13  ;;  %s918_s6 = smov [#allocation7]  }
  0x48   : > { %619 = vmatpush3.bf16.msra.mxu0 %v714_v2  ;;  %s773_s17 = sshll.u32 %s918_s6, 4  ;;  %s774_s17 = int_to_ptr.vmem [resolvable:$false] %s773_s17 }
  0x49   : > { %p771_p8 = pnand %p770_p4, %p1037_p0  ;;  %s775_s29 = scalar_lea.vmem %s774_s17, 128 }
  0x4a   : > { %p776_p3 = scmp.lt.s32.totalorder %s406_s9, %s774_s17  ;;  %p777_p5 = scmp.lt.s32.totalorder %s775_s29, %s769_s13 }
  0x4b   : > { %621 = vmatmul.mubr.msk.bf16.vlgmr.msra.gmra.mxu0 %vm320_vm1, %v296_v4  ;;  %p772_p12 = pneg %p771_p8 }
  0x4c   : > { %p778_p7 = por %p777_p5, %p776_p3 }
  0x4e   : > { %p779_p2 = pnand %p778_p7, %p772_p12 }
 0x10b   : > { %v358_v6 = vpop.f32.mrf.mxu0 }
 0x10c   : > { %v359_v7 = vadd.f32 %v599_v5, %v358_v6 }
 0x10d   : > { %v622_v8 = vpop.f32.mrf.mxu0 }
 0x10e   : > { %v364_v9 = vmul.f32 0.35355338, %v359_v7  ;;  %v612_v10 = vpack.c.bf16 %v359_v7, %v359_v7 }
 0x10f   : > { %v361_v11 = vpop.f32.mrf.mxu0 }
 0x110   : > { %v365_v12 = vpack.c.bf16 %v364_v9, %v364_v9  ;;  %372 = vrot.lane.b32.xlu0 %v612_v10, %s917_s10 }
 0x111   : > { %v623_v13 = vpop.f32.mrf.mxu0 }
 0x112   : > { %367 = vst.msk [vmem:[%s279_s7] sm:$0xf] %vm366_vm2, %v365_v12 }
 0x113   : > { %782 = shalt.err (!%p779_p2)
}
 0x114   : > { %s783_s8 = scalar_lea.hbm %s1091_s16, 64  ;;  %s787_s25 = scalar_lea.hbm %s1196_s3, 128 }
 0x115   : > { %p784_p6 = scmp.ne.s32.totalorder %s1091_s16, %s783_s8  ;;  %p788_p11 = scmp.lt.s32.totalorder %s1091_s16, %s1196_s3 }
 0x116   : > { %p789_p1 = scmp.lt.s32.totalorder %s787_s25, %s783_s8 }
 0x117   : > { %p785_p9 = pnand %p784_p6, %p1037_p0 }
 0x118   : > { %p790_p10 = por %p789_p1, %p788_p11 }
 0x119   : > { %p786_p13 = pneg %p785_p9 }
 0x11b   : > { %p791_p4 = pnand %p790_p10, %p786_p13 }
 0x11d   : > { %794 = shalt.err (!%p791_p4)
}
 0x11e   : > { %630 = dma.vmem_to_hbm [thread:$0]  (%p1037_p0), %s406_s9, 64, %s1091_s16, %s381_s21  }
 0x11f   : > { %s919_s11 = smov 64   ;;  %s385_s12 = sand.u32 1, %s983_s24  }
 0x120   : > { %376 = vrot.lane.b32.xlu0 %v612_v10, %s919_s11  ;;  %s286_s13 = scalar_lea.vmem [#allocation8], %s1081_s26  ;;  %s1117_s8 = scalar_lea.hbm %s1197_s4, %s1084_s28 }
 0x121   : > { %s419_s6 = sshll.u32 %s286_s13, 4  ;;  %s293_s14 = scalar_lea.vmem [#allocation10], %s1081_s26  ;;  %s1119_s6 = int_to_ptr.vmem [resolvable:$true] %s419_s6 }
 0x122   : > { %s433_s1 = sshll.u32 %s293_s14, 4  ;;  %s1125_s9 = scalar_lea.sflag [#allocation9], %s385_s12  ;;  %s434_s1 = int_to_ptr.vmem [resolvable:$true] %s433_s1 }
 0x123   : > { %s795_s24 = scalar_lea.vmem %s1119_s6, 64  ;;  %s920_s16 = smov [#allocation8]  }
 0x124   : > { %p796_p8 = scmp.ne.s32.totalorder %s1119_s6, %s795_s24  ;;  %s799_s21 = sshll.u32 %s920_s16, 4  ;;  %s800_s21 = int_to_ptr.vmem [resolvable:$false] %s799_s21 }
 0x125   : > { %s801_s25 = scalar_lea.vmem %s800_s21, 128  ;;  %p802_p5 = scmp.lt.s32.totalorder %s1119_s6, %s800_s21 }
 0x126   : > { %p797_p12 = pnand %p796_p8, %p1037_p0  ;;  %p803_p7 = scmp.lt.s32.totalorder %s801_s25, %s795_s24 }
 0x128   : > { %p798_p3 = pneg %p797_p12  ;;  %p804_p2 = por %p803_p7, %p802_p5 }
 0x12a   : > { %p805_p6 = pnand %p804_p2, %p798_p3 }
 0x182   : > { %v373_v14 = vpop.permute.xlu0 %372 }
 0x183   : > { %375 = vst.msk [vmem:[%s286_s13] sm:$0xf] %vm366_vm2, %v373_v14 }
 0x184   : > { %808 = shalt.err (!%p805_p6)
}
 0x185   : > { %s809_s7 = scalar_lea.hbm %s1117_s8, 64  ;;  %s813_s12 = scalar_lea.hbm %s1197_s4, 128 }
 0x186   : > { %p810_p9 = scmp.ne.s32.totalorder %s1117_s8, %s809_s7  ;;  %p814_p1 = scmp.lt.s32.totalorder %s1117_s8, %s1197_s4 }
 0x187   : > { %p815_p10 = scmp.lt.s32.totalorder %s813_s12, %s809_s7 }
 0x188   : > { %p811_p13 = pnand %p810_p9, %p1037_p0 }
 0x189   : > { %p816_p4 = por %p815_p10, %p814_p1 }
 0x18a   : > { %p812_p11 = pneg %p811_p13 }
 0x18c   : > { %p817_p8 = pnand %p816_p4, %p812_p11 }
 0x18e   : > { %820 = shalt.err (!%p817_p8)
}
 0x18f   : > { %631 = dma.vmem_to_hbm [thread:$0]  (%p1037_p0), %s1119_s6, 64, %s1117_s8, %s1125_s9  }
 0x190   : > { %s431_s16 = scalar_lea.hbm %s1198_s5, %s1084_s28  ;;  %s821_s21 = scalar_lea.vmem %s434_s1, 64 }
 0x191   : > { %p822_p12 = scmp.ne.s32.totalorder %s434_s1, %s821_s21  ;;  %s921_s25 = smov [#allocation10]  }
 0x192   : > { %v377_v15 = vpop.permute.xlu0 %376  ;;  %s825_s7 = sshll.u32 %s921_s25, 4  ;;  %s826_s7 = int_to_ptr.vmem [resolvable:$false] %s825_s7 }
 0x193   : > { %379 = vst.msk [vmem:[%s293_s14] sm:$0xf] %vm366_vm2, %v377_v15  ;;  %p823_p3 = pnand %p822_p12, %p1037_p0  ;;  %s827_s10 = scalar_lea.vmem %s826_s7, 128 }
 0x194   : > { %p828_p7 = scmp.lt.s32.totalorder %s434_s1, %s826_s7  ;;  %p829_p2 = scmp.lt.s32.totalorder %s827_s10, %s821_s21 }
 0x195   : > { %p824_p5 = pneg %p823_p3 }
 0x196   : > { %p830_p6 = por %p829_p2, %p828_p7 }
 0x198   : > { %p831_p9 = pnand %p830_p6, %p824_p5 }
 0x19a   : > { %834 = shalt.err (!%p831_p9)
}
 0x19b   : > { %s835_s28 = scalar_lea.hbm %s431_s16, 64  ;;  %s839_s8 = scalar_lea.hbm %s1198_s5, 128 }
 0x19c   : > { %p836_p13 = scmp.ne.s32.totalorder %s431_s16, %s835_s28  ;;  %p840_p10 = scmp.lt.s32.totalorder %s431_s16, %s1198_s5 }
 0x19d   : > { %p841_p4 = scmp.lt.s32.totalorder %s839_s8, %s835_s28 }
 0x19e   : > { %p837_p11 = pnand %p836_p13, %p1037_p0 }
 0x19f   : > { %p842_p8 = por %p841_p4, %p840_p10 }
 0x1a0   : > { %p838_p1 = pneg %p837_p11 }
 0x1a2   : > { %p843_p12 = pnand %p842_p8, %p838_p1 }
 0x1a4   : > { %846 = shalt.err (!%p843_p12)
}
 0x1a5   : > { %632 = dma.vmem_to_hbm [thread:$0]  (%p1037_p0), %s434_s1, 64, %s431_s16, %s1125_s9  }
 0x1a6 PF: > { %s445_s12 = sand.u32 1, %s889_s18   ;;  %p1215_p3 = scmp.ne.s32.totalorder %s1204_s27, 0 }
 0x1a7   : > { %p1216_p5 = scmp.ge.s32.totalorder %s909_s23, 2  ;;  %s446_s13 = scalar_lea.sflag [#allocation4], %s445_s12 }
 0x1a9   : > { %p645_p7 = pnand %p1216_p5, %p1215_p3 }
 0x1ab   : > { %p646_p2 = pneg %p645_p7 }
 0x1ad   : > { %880 = dma.done.wait (%p646_p2), %s446_s13, 64  }
 0x1ae   : > { %882 = vsyncadd (%p646_p2), %s446_s13, 4294967232  ;;  %s1217_s17 = sadd.s32 4294967294, %s909_s23  }
 0x1af   : > { %s454_s29 = sand.u32 1, %s1217_s17  }
 0x1b0   : > { %s455_s24 = scalar_lea.sflag [#allocation9], %s454_s29 }
 0x1b1   : > { %884 = dma.done.wait (%p646_p2), %s455_s24, 128  }
 0x1b2   : > { %886 = vsyncadd (%p646_p2), %s455_s24, 4294967168  ;;  %s26_s23 = sadd.s32 1, %s909_s23   ;;  %s1218_s27 = sld [smem:[#allocation15_spill]] }
 0x1b3   : > { %p23_p0 = scmp.ge.s32.totalorder %s26_s23, 4   ;;  %s1219_s18 = smov %s893_s19 }
 0x1b4   : > { %s1220_s19 = smov %s897_s20  ;;  %s1221_s20 = smov %s1046_s30 }
 0x1b5   : > { %s1222_s21 = smov %s905_s22  ;;  %25 = sbr.rel (!%p23_p0) target bundleno = 11 (0xb), region = 113 }
 0x1b8   : > { %s1223_s22 = smov %s1218_s27 }
 0x1ba   :  { %469 = vsyncpa [#allocation3], 1 }
 0x1bb   :  { %471 = vsyncpa [#allocation3 + $0x1], 1 }
 0x1bc   :  { %472 = vsyncpa [#allocation6], 1 }
 0x1bd   :  { %473 = vsyncpa [#allocation4], 1 }
 0x1be   :  { %475 = vsyncpa [#allocation4 + $0x1], 1 }
 0x1bf   :  { %476 = vsyncpa [#allocation9], 1 }
 0x1c0   :  { %478 = vsyncpa [#allocation9 + $0x1], 1 }

</bundles_post_ra>
